<compile_context>
chip_gen: v6e
topology: v6e:2x2x1
jax: 0.10.0
libtpu: 0.0.40
codegen_flags: <defaults>
</compile_context>

<pallas_src>
import functools

import jax
import jax.numpy as jnp
from jax.experimental import pallas as pl
from jax.experimental.pallas import tpu as pltpu

RELU_SLOPE = 0.2  # deterministic choice for the constructor arg `relu_slope`
# `inplace` has no functional effect on the forward pass.

_INV_SQRT2 = 0.7071067811865476

_TARGET_BLOCK_BYTES = 4 * 1024 * 1024        # per-block footprint target
_MAX_SINGLE_BLOCK_BYTES = 8 * 1024 * 1024    # cap for the "one full block" path
_LANE_CANDIDATES = (1024, 512, 256, 128)     # lane-dense, multiples of 128


def _round_up(x, m):
    return ((x + m - 1) // m) * m


def _sublane_multiple(itemsize):
    # Native packed sublane count per vreg: f32 -> 8, bf16/f16 -> 16, 8-bit -> 32.
    return {4: 8, 2: 16, 1: 32}.get(itemsize, 8)


def _choose_layout(total, itemsize):
    """Pick (lane, rows, block_rows, pad_elems) for a lane-dense 2D view."""
    sub = _sublane_multiple(itemsize)

    # 1) Lane: largest candidate dividing the element count -> zero padding.
    lane = None
    for cand in _LANE_CANDIDATES:
        if total % cand == 0:
            lane = cand
            break
    pad = 0
    if lane is None:                       # last-resort fallback (odd sizes)
        lane = 128
        pad = _round_up(total, lane) - total
    rows = (total + pad) // lane

    # 2) Block rows: multiple of the sublane pack, <= ~4 MiB per block, and
    #    capped so the grid has >= 2 steps (both TensorCores on v7x) when
    #    the tensor is big enough to split.
    cap = max(sub, (_TARGET_BLOCK_BYTES // (lane * itemsize)) // sub * sub)
    if rows > sub:
        cap = min(cap, max(sub, _round_up(-(-rows // 2), sub)))

    if rows % sub == 0:
        brows = min(cap, rows)
        while rows % brows:
            brows -= sub                   # terminates at brows == sub
    else:
        if rows * lane * itemsize <= _MAX_SINGLE_BLOCK_BYTES:
            brows = rows                   # block == full array dims (allowed)
        else:
            new_rows = _round_up(rows, sub)      # pad fallback, rare
            pad += (new_rows - rows) * lane
            rows = new_rows
            brows = min(cap, rows)
            while rows % brows:
                brows -= sub

    return lane, rows, brows, pad


def _frn_kernel(x_ref, o_ref, *, slope):
    x = x_ref[...].astype(jnp.float32)

    # LeakyReLU: for 0 <= slope <= 1, max(x, slope*x) is exact and cheapest.
    if 0.0 <= slope <= 1.0:
        l1 = jnp.maximum(x, slope * x)
    else:
        l1 = jnp.where(x >= 0.0, x, slope * x)

    # Exact (erf-based) GELU, matching torch.nn.GELU() default.
    g = 0.5 * x * (1.0 + jax.lax.erf(x * _INV_SQRT2))

    # s = out1 + out2 = 0.5267*LeakyReLU(x) + 0.4733*GELU(x)
    s = 0.5267 * l1 + 0.4733 * g
    if 0.0 <= slope <= 1.0:
        l2 = jnp.maximum(s, slope * s)
    else:
        l2 = jnp.where(s >= 0.0, s, slope * s)

    # y = 0.4591*LeakyReLU(s) + 0.5497*GELU(x)
    o_ref[...] = (0.4591 * l2 + 0.5497 * g).astype(o_ref.dtype)


def frn(x, relu_slope=RELU_SLOPE):
    """FRN forward pass. x: any shape / float dtype (purely elementwise)."""
    if not isinstance(relu_slope, (int, float)):
        raise TypeError(
            "relu_slope must be a concrete Python number; it is baked into "
            "the kernel as a compile-time constant.")
    slope = float(relu_slope)

    orig_shape = x.shape
    total = x.size
    if total == 0:
        return x

    itemsize = jnp.dtype(x.dtype).itemsize
    lane, rows, brows, pad = _choose_layout(total, itemsize)

    flat = x.reshape(-1)
    if pad:  # rare fallback; common conv shapes take the zero-copy path
        flat = jnp.pad(flat, (0, pad))
    x2d = flat.reshape(rows, lane)

    kernel = functools.partial(_frn_kernel, slope=slope)
    out2d = pl.pallas_call(
        kernel,
        out_shape=jax.ShapeDtypeStruct((rows, lane), x.dtype),
        grid_spec=pl.GridSpec(
            grid=(rows // brows,),
            in_specs=[pl.BlockSpec((brows, lane), lambda i: (i, 0))],
            out_specs=pl.BlockSpec((brows, lane), lambda i: (i, 0)),
        ),
        compiler_params=pltpu.CompilerParams(
            dimension_semantics=("parallel",),
            vmem_limit_bytes=32 * 1024 * 1024,
        ),
    )(x2d)

    out = out2d.reshape(-1)
    if pad:
        out = out[:total]
    return out.reshape(orig_shape)


def _frn_reference(x, relu_slope=RELU_SLOPE):
    """Pure-JAX reference mirroring the PyTorch module."""
    xf = x.astype(jnp.float32)
    lrelu = jnp.where(xf >= 0.0, xf, relu_slope * xf)
    gelu = 0.5 * xf * (1.0 + jax.lax.erf(xf * _INV_SQRT2))
    out1 = 0.5267 * lrelu
    out2 = 0.4733 * gelu
    out3 = 0.5497 * gelu
    s = out1 + out2
    lrelu2 = jnp.where(s >= 0.0, s, relu_slope * s)
    return (0.4591 * lrelu2 + out3).astype(x.dtype)


if __name__ == "__main__":
    key = jax.random.PRNGKey(0)
    k1, k2, k3, k4 = jax.random.split(key, 4)

    # 1) Small conv-like f32 tensor (zero-copy path, single full block).
    x1 = jax.random.normal(k1, (2, 4, 16, 16), dtype=jnp.float32)
    y1 = jax.block_until_ready(frn(x1))
    assert y1.shape == x1.shape and y1.dtype == x1.dtype
    assert jnp.allclose(y1, _frn_reference(x1), atol=1e-5, rtol=1e-5)

    # 2) Larger f32 tensor (multi-step grid, zero-copy path).
    x2 = jax.random.normal(k2, (2, 16, 64, 64), dtype=jnp.float32)
    y2 = jax.block_until_ready(frn(x2))
    assert jnp.allclose(y2, _frn_reference(x2), atol=1e-5, rtol=1e-5)

    # 3) bf16 activations (16-sublane packing path).
    x3 = jax.random.normal(k3, (2, 8, 32, 32), dtype=jnp.bfloat16)
    y3 = jax.block_until_ready(frn(x3))
    assert y3.dtype == jnp.bfloat16
    assert jnp.allclose(y3.astype(jnp.float32),
                        _frn_reference(x3).astype(jnp.float32),
                        atol=2e-2, rtol=2e-2)

    # 4) Odd, non-128-divisible shape (exercises the padding fallback).
    x4 = jax.random.normal(k4, (3, 5, 7, 11), dtype=jnp.float32)
    y4 = jax.block_until_ready(frn(x4))
    assert jnp.allclose(y4, _frn_reference(x4), atol=1e-5, rtol=1e-5)

    print("KERNEL_OK")
</pallas_src>

<mosaic_0001>
module attributes {stable_mosaic.version = 11 : i64} {
  func.func @_frn_kernel(%arg0: i32, %arg1: memref<2x1024xf32, #tpu.memory_space<vmem>>, %arg2: memref<2x1024xf32, #tpu.memory_space<vmem>>) attributes {dimension_semantics = [#tpu.dimension_semantics<parallel>], iteration_bounds = array<i64: 1>, scalar_prefetch = 0 : i64, scratch_operands = 0 : i64, tpu.core_type = #tpu.core_type<tc>, window_params = [{transform_indices = @transform_0, window_bounds = array<i64: 2, 1024>}, {transform_indices = @transform_1, window_bounds = array<i64: 2, 1024>}]} {
    %c0 = arith.constant 0 : index
    %c0_0 = arith.constant 0 : index
    %0 = vector.load %arg1[%c0, %c0_0] : memref<2x1024xf32, #tpu.memory_space<vmem>>, vector<2x1024xf32>
    %cst = arith.constant 2.000000e-01 : f32
    %1 = vector.broadcast %cst : f32 to vector<2x1024xf32>
    %2 = arith.mulf %1, %0 : vector<2x1024xf32>
    %3 = arith.maximumf %0, %2 : vector<2x1024xf32>
    %cst_1 = arith.constant 5.000000e-01 : f32
    %4 = vector.broadcast %cst_1 : f32 to vector<2x1024xf32>
    %5 = arith.mulf %4, %0 : vector<2x1024xf32>
    %cst_2 = arith.constant 0.707106769 : f32
    %6 = vector.broadcast %cst_2 : f32 to vector<2x1024xf32>
    %7 = arith.mulf %0, %6 : vector<2x1024xf32>
    %8 = math.erf %7 : vector<2x1024xf32>
    %cst_3 = arith.constant 1.000000e+00 : f32
    %9 = vector.broadcast %cst_3 : f32 to vector<2x1024xf32>
    %10 = arith.addf %9, %8 : vector<2x1024xf32>
    %11 = arith.mulf %5, %10 : vector<2x1024xf32>
    %cst_4 = arith.constant 5.267000e-01 : f32
    %12 = vector.broadcast %cst_4 : f32 to vector<2x1024xf32>
    %13 = arith.mulf %12, %3 : vector<2x1024xf32>
    %cst_5 = arith.constant 4.733000e-01 : f32
    %14 = vector.broadcast %cst_5 : f32 to vector<2x1024xf32>
    %15 = arith.mulf %14, %11 : vector<2x1024xf32>
    %16 = arith.addf %13, %15 : vector<2x1024xf32>
    %cst_6 = arith.constant 2.000000e-01 : f32
    %17 = vector.broadcast %cst_6 : f32 to vector<2x1024xf32>
    %18 = arith.mulf %17, %16 : vector<2x1024xf32>
    %19 = arith.maximumf %16, %18 : vector<2x1024xf32>
    %cst_7 = arith.constant 4.591000e-01 : f32
    %20 = vector.broadcast %cst_7 : f32 to vector<2x1024xf32>
    %21 = arith.mulf %20, %19 : vector<2x1024xf32>
    %cst_8 = arith.constant 5.497000e-01 : f32
    %22 = vector.broadcast %cst_8 : f32 to vector<2x1024xf32>
    %23 = arith.mulf %22, %11 : vector<2x1024xf32>
    %24 = arith.addf %21, %23 : vector<2x1024xf32>
    %c0_9 = arith.constant 0 : index
    %c0_10 = arith.constant 0 : index
    %25 = vector.load %arg2[%c0_9, %c0_10] : memref<2x1024xf32, #tpu.memory_space<vmem>>, vector<2x1024xf32>
    tpu.vector_store %arg2[%c0_9, %c0_10], %24 {strides = array<i32>} : memref<2x1024xf32, #tpu.memory_space<vmem>>, vector<2x1024xf32>,
    return
  }
  func.func @transform_0(%arg0: i32) -> (i32, i32) {
    %c0_i32 = arith.constant 0 : i32
    %c0_i32_0 = arith.constant 0 : i32
    return %arg0, %c0_i32 : i32, i32
  }
  func.func @transform_1(%arg0: i32) -> (i32, i32) {
    %c0_i32 = arith.constant 0 : i32
    %c0_i32_0 = arith.constant 0 : i32
    return %arg0, %c0_i32 : i32, i32
  }
}

</mosaic_0001>

<bundles_post_ra>
// kernel: tpu_custom_call.1
= control target key start
LH: loop header
LB: loop body
LE: loop exit
PB: predicated region body
PF: predicated region fallthrough
CT: control target
= control target key end

     0   :  { %6 = vsyncpa [#allocation3], 0  ;;  %s138_s0 = inlined_call_operand.hbm [shape: f32[2,1024], index: 0, kind: input, shape index: {}]   ;;  %s139_s1 = inlined_call_operand.hbm [shape: f32[2,1024], index: 1, kind: output, shape index: {}]  }
   0x1   :  { %7 = vsyncpa [#allocation4], 0  ;;  %s120_s6 = smov [#allocation2]  }
   0x2   :  { %s14_s7 = sshll.u32 %s120_s6, 4  ;;  %s15_s7 = int_to_ptr.vmem [resolvable:$true] %s14_s7 }
   0x3   :  { %s84_s8 = scalar_lea.vmem %s15_s7, 256  ;;  %p89_p1 = scmp.lt.s32.totalorder %s15_s7, %s15_s7 }
   0x4   :  { %p85_p0 = scmp.ne.s32.totalorder %s15_s7, %s84_s8  ;;  %p90_p2 = scmp.lt.s32.totalorder %s84_s8, %s84_s8 }
   0x6   :  { %p91_p3 = por %p90_p2, %p89_p1 }
   0x8   :  { %p92_p4 = pnand %p91_p3, %p85_p0 }
   0xa   :  { %95 = shalt.err (!%p92_p4)
}
   0xb   :  { %17 = dma.hbm_to_vmem [thread:$0]  %s138_s0, 256, %s15_s7, [#allocation3]  }
   0xc   :  { %116 = dma.done.wait [#allocation3], 256  }
   0xd   :  { %117 = vsyncadd [#allocation3], 4294967040  ;;  %v21_v0 = vld [vmem:[#allocation2] sm:$0xff]  ;;  %v22_v1 = vld [vmem:[#allocation2 + $0x8] sm:$0xff]  ;;  %s121_s0 = smov [#allocation5]  }
   0xe   :  { %v29_v2 = vmul.f32 0.70710677, %v21_v0  ;;  %v30_v3 = vmul.f32 0.70710677, %v22_v1  ;;  %v23_v4 = vmul.f32 0.2, %v21_v0 }
   0xf   :  { %v24_v5 = vmul.f32 0.2, %v22_v1  ;;  %v27_v7 = vmul.f32 0.5, %v21_v0  ;;  %v28_v10 = vmul.f32 0.5, %v22_v1  ;;  %s61_s11 = sshll.u32 %s121_s0, 4  ;;  %s62_s11 = int_to_ptr.vmem [resolvable:$true] %s61_s11 }
  0x10   :  { %72 = verf.f32 %v29_v2  ;;  %v25_v6 = vmax.f32 %v21_v0, %v23_v4  ;;  %s96_s12 = scalar_lea.vmem %s62_s11, 256  ;;  %p101_p6 = scmp.lt.s32.totalorder %s62_s11, %s62_s11 }
  0x11   :  { %74 = verf.f32 %v30_v3  ;;  %v26_v9 = vmax.f32 %v22_v1, %v24_v5  ;;  %p97_p5 = scmp.ne.s32.totalorder %s62_s11, %s96_s12  ;;  %p102_p7 = scmp.lt.s32.totalorder %s96_s12, %s96_s12 }
  0x12   :  { %v37_v15 = vmul.f32 0.5267, %v25_v6 }
  0x13   :  { %v38_v17 = vmul.f32 0.5267, %v26_v9  ;;  %p103_p8 = por %p102_p7, %p101_p6 }
  0x15   :  { %p104_p9 = pnand %p103_p8, %p97_p5 }
  0x1d   :  { %v73_v8 = vpop.eup %72 }
  0x1e   :  { %v75_v11 = vpop.eup %74  ;;  %v33_v12 = vadd.f32 1.0, %v73_v8 }
  0x1f   :  { %v34_v13 = vadd.f32 1.0, %v75_v11 }
  0x20   :  { %v35_v14 = vmul.f32 %v33_v12, %v27_v7 }
  0x21   :  { %v36_v16 = vmul.f32 %v34_v13, %v28_v10 }
  0x22   :  { %v39_v18 = vmul.f32 0.4733, %v35_v14  ;;  %v49_v25 = vmul.f32 0.5497, %v35_v14 }
  0x23   :  { %v40_v19 = vmul.f32 0.4733, %v36_v16  ;;  %v50_v27 = vmul.f32 0.5497, %v36_v16 }
  0x24   :  { %v41_v20 = vadd.f32 %v39_v18, %v37_v15 }
  0x25   :  { %v42_v21 = vadd.f32 %v40_v19, %v38_v17 }
  0x26   :  { %v43_v22 = vmul.f32 0.2, %v41_v20 }
  0x27   :  { %v44_v23 = vmul.f32 0.2, %v42_v21 }
  0x28   :  { %v45_v24 = vmax.f32 %v41_v20, %v43_v22 }
  0x29   :  { %v46_v26 = vmax.f32 %v42_v21, %v44_v23 }
  0x2a   :  { %v47_v28 = vmul.f32 0.4591, %v45_v24 }
  0x2b   :  { %v48_v29 = vmul.f32 0.4591, %v46_v26 }
  0x2c   :  { %v51_v30 = vadd.f32 %v49_v25, %v47_v28 }
  0x2d   :  { %v52_v31 = vadd.f32 %v50_v27, %v48_v29 }
  0x2e   :  { %53 = vst [vmem:[#allocation5] sm:$0xff] %v51_v30 }
  0x2f   :  { %54 = vst [vmem:[#allocation5 + $0x8] sm:$0xff] %v52_v31 }
  0x30   :  { %107 = shalt.err (!%p104_p9)
}
  0x31   :  { %64 = dma.vmem_to_hbm [thread:$0]  %s62_s11, 256, %s139_s1, [#allocation4]  }
  0x32   :  { %118 = dma.done.wait [#allocation4], 256  }
  0x33   :  { %119 = vsyncadd [#allocation4], 4294967040 }
  0x34   :  { %68 = vsyncpa [#allocation3], 1 }
  0x35   :  { %69 = vsyncpa [#allocation4], 1 }

</bundles_post_ra>
